<compile_context>
chip_gen: v7x
topology: tpu7x:2x2x1
jax: 0.10.0
libtpu: 0.0.40
codegen_flags: <defaults>
</compile_context>

<pallas_src>
import functools

import jax
import jax.numpy as jnp
from jax.experimental import pallas as pl
from jax.experimental.pallas import tpu as pltpu


def _augment_kernel(params_ref, flags_ref, x_ref, noise_ref, o_ref, *, H, W):
    # params_ref (SMEM f32[6]):
    #   [0] g0 : outer tap of the 3-tap Gaussian (g2 == g0)
    #   [1] g1 : center tap
    #   [2] noise sigma
    #   [3] effective brightness shift (0 if skipped)
    #   [4] effective affine scale     (1 if skipped)
    #   [5] effective affine bias      (0 if skipped)
    # flags_ref (SMEM i32[2]): [apply_blur, apply_noise]
    L = H * W

    # ---- stage 1: separable 3x3 Gaussian blur, reflect-101 borders (p = 0.5) ----
    @pl.when(flags_ref[0] != 0)
    def _():
        g0 = params_ref[0]
        g1 = params_ref[1]
        x = x_ref[...]

        # Position masks on the flattened H*W lane axis, computed once, reused
        # by both passes.
        idx = jax.lax.broadcasted_iota(jnp.int32, x.shape, 1)
        w = idx % W
        w_first = w == 0            # first column of each image row
        w_last = w == W - 1         # last column of each image row
        h_first = idx < W           # first image row
        h_last = idx >= L - W       # last image row

        def blur_pass(v, shift, first_mask, last_mask):
            # pltpu.roll: result[i] = v[i - shift] (XLU, off the VALU slot).
            prev = pltpu.roll(v, shift=shift, axis=1)       # v[i - shift]
            nxt = pltpu.roll(v, shift=L - shift, axis=1)    # v[i + shift]
            # Directional reflect-101 fixups; note nxt_f uses the ORIGINAL prev.
            prev_f = jnp.where(first_mask, nxt, prev)
            nxt_f = jnp.where(last_mask, prev, nxt)
            # Symmetric taps (g2 == g0): fold into one multiply.
            return g0 * (prev_f + nxt_f) + g1 * v

        x = blur_pass(x, 1, w_first, w_last)   # horizontal (within each row)
        x = blur_pass(x, W, h_first, h_last)   # vertical (stride W in flat layout)
        o_ref[...] = x

    @pl.when(flags_ref[0] == 0)
    def _():
        o_ref[...] = x_ref[...]

    # ---- stage 2: additive Gaussian noise + clip (p = 0.5), gated ----
    @pl.when(flags_ref[1] != 0)
    def _():
        sigma = params_ref[2]
        o_ref[...] = jnp.clip(o_ref[...] + sigma * noise_ref[...], 0.0, 1.0)

    # ---- stages 3 & 4: brightness (p = 0.5) and affine perturbation (p = 0.2),
    # folded into scalars on the host (identity params when skipped) ----
    mag = params_ref[3]
    scale = params_ref[4]
    bias = params_ref[5]
    y = jnp.clip(o_ref[...] + mag, 0.0, 1.0)
    o_ref[...] = jnp.clip(scale * y + bias, 0.0, 1.0)


def image_augment(im, key):
    """Forward pass of ImageAugment.  im: f32[N, C, H, W] with values in [0, 1]."""
    N, C, H, W = im.shape
    NC, HW = N * C, H * W
    x = im.reshape(NC, HW).astype(jnp.float32)

    keys = jax.random.split(key, 7)

    # Python `random` branch decisions, reproduced deterministically.
    u = jax.random.uniform(keys[0], (4,))
    f_blur = u[0] > 0.5
    f_noise = u[1] > 0.5
    f_bright = (u[2] > 0.5).astype(jnp.float32)
    f_pert = (u[3] > 0.8).astype(jnp.float32)

    sigma_blur = jax.random.uniform(keys[1], (), minval=0.25, maxval=1.5)
    sigma_noise = jax.random.uniform(keys[2], (), minval=0.01, maxval=0.15)
    mag = jax.random.uniform(keys[3], (), minval=-0.1, maxval=0.1)
    scale = jax.random.uniform(keys[4], (), minval=0.1, maxval=0.8)
    bias = jax.random.uniform(keys[5], (), minval=-0.1, maxval=0.1)

    # cv2.getGaussianKernel(3, sigma): symmetric 3-tap weights [g0, g1, g0].
    g_side = jnp.exp(-1.0 / (2.0 * sigma_blur ** 2))
    g0 = g_side / (2.0 * g_side + 1.0)
    g1 = 1.0 / (2.0 * g_side + 1.0)

    params = jnp.stack([
        g0, g1,
        sigma_noise,
        f_bright * mag,                       # effective brightness shift
        f_pert * scale + (1.0 - f_pert),      # effective affine scale
        f_pert * bias,                        # effective affine bias
    ]).astype(jnp.float32)
    flags = jnp.stack([f_blur, f_noise]).astype(jnp.int32)

    # Exact N(0,1) noise, generated portably on the host (tiling-independent).
    # TODO(synk): replace with an in-kernel pltpu.stateful_normal draw on real
    # TPU hardware to remove this image-sized HBM read.
    noise = jax.random.normal(keys[6], (NC, HW), dtype=jnp.float32)

    # ---- block sizing: ~2 MiB blocks, block_nc multiple of 8, padded NC ----
    bytes_per_row = HW * 4
    target_block_bytes = 2 << 20   # safe for v7x's 64 MiB VMEM, ample for v5e/v6e
    cap_rows = max(8, ((target_block_bytes // bytes_per_row) // 8) * 8)
    block_nc = min(cap_rows, ((NC + 7) // 8) * 8)
    num_blocks = -(-NC // block_nc)
    if num_blocks > 1 and num_blocks % 2:
        num_blocks += 1            # even grid keeps both v7x TensorCores busy
    nc_pad = num_blocks * block_nc
    if nc_pad != NC:
        pad = ((0, nc_pad - NC), (0, 0))
        x = jnp.pad(x, pad)
        noise = jnp.pad(noise, pad)

    kernel = functools.partial(_augment_kernel, H=H, W=W)
    out = pl.pallas_call(
        kernel,
        out_shape=jax.ShapeDtypeStruct((nc_pad, HW), jnp.float32),
        grid=(num_blocks,),
        in_specs=[
            pl.BlockSpec(memory_space=pltpu.MemorySpace.SMEM),     # scalar params
            pl.BlockSpec(memory_space=pltpu.MemorySpace.SMEM),     # apply flags
            pl.BlockSpec((block_nc, HW), lambda i: (i, 0)),        # image block
            pl.BlockSpec((block_nc, HW), lambda i: (i, 0)),        # noise block
        ],
        out_specs=pl.BlockSpec((block_nc, HW), lambda i: (i, 0)),
        compiler_params=pltpu.CompilerParams(
            dimension_semantics=("parallel",),
            vmem_limit_bytes=48 * 1024 * 1024,
        ),
    )(params, flags, x, noise)

    return out[:NC].reshape(N, C, H, W)


if __name__ == "__main__":
    key = jax.random.PRNGKey(0)
    k_im, k_aug = jax.random.split(key)
    # Small NCHW batch of images with values in [0, 1] (the module's domain).
    im = jax.random.uniform(k_im, (2, 4, 16, 16), dtype=jnp.float32)

    out = image_augment(im, k_aug)
    jax.block_until_ready(out)
    assert out.shape == im.shape and out.dtype == jnp.float32
    assert bool(jnp.all(jnp.isfinite(out)))
    assert bool(jnp.all((out >= 0.0) & (out <= 1.0)))
    print("KERNEL_OK")
</pallas_src>

<mosaic_0001>
module attributes {stable_mosaic.version = 11 : i64} {
  func.func @_augment_kernel(%arg0: i32, %arg1: memref<6xf32, #tpu.memory_space<smem>>, %arg2: memref<2xi32, #tpu.memory_space<smem>>, %arg3: memref<8x256xf32, #tpu.memory_space<vmem>>, %arg4: memref<8x256xf32, #tpu.memory_space<vmem>>, %arg5: memref<8x256xf32, #tpu.memory_space<vmem>>) attributes {dimension_semantics = [#tpu.dimension_semantics<parallel>], iteration_bounds = array<i64: 1>, scalar_prefetch = 0 : i64, scratch_operands = 0 : i64, tpu.core_type = #tpu.core_type<tc>, window_params = [{transform_indices = @transform_0, window_bounds = array<i64: 6>}, {transform_indices = @transform_1, window_bounds = array<i64: 2>}, {transform_indices = @transform_2, window_bounds = array<i64: 8, 256>}, {transform_indices = @transform_3, window_bounds = array<i64: 8, 256>}, {transform_indices = @transform_4, window_bounds = array<i64: 8, 256>}]} {
    %c0 = arith.constant 0 : index
    %0 = memref.load %arg2[%c0] : memref<2xi32, #tpu.memory_space<smem>>
    %c0_i32 = arith.constant 0 : i32
    %1 = arith.cmpi ne, %0, %c0_i32 : i32
    %2 = arith.extui %1 : i1 to i32
    %c0_i32_0 = arith.constant 0 : i32
    %3 = arith.cmpi ne, %2, %c0_i32_0 : i32
    scf.if %3 {
      %c0_13 = arith.constant 0 : index
      %31 = memref.load %arg1[%c0_13] : memref<6xf32, #tpu.memory_space<smem>>
      %c1_14 = arith.constant 1 : index
      %32 = memref.load %arg1[%c1_14] : memref<6xf32, #tpu.memory_space<smem>>
      %c0_15 = arith.constant 0 : index
      %c0_16 = arith.constant 0 : index
      %33 = vector.load %arg3[%c0_15, %c0_16] : memref<8x256xf32, #tpu.memory_space<vmem>>, vector<8x256xf32>
      %34 = tpu.iota {dimensions = array<i32: 1>} : vector<8x256xi32>
      %c16_i32 = arith.constant 16 : i32
      %c0_i32_17 = arith.constant 0 : i32
      %35 = arith.cmpi eq, %c16_i32, %c0_i32_17 : i32
      %c1_i32 = arith.constant 1 : i32
      %36 = arith.select %35, %c1_i32, %c16_i32 : i32
      %37 = vector.broadcast %36 : i32 to vector<8x256xi32>
      %38 = arith.remsi %34, %37 : vector<8x256xi32>
      %c0_i32_18 = arith.constant 0 : i32
      %39 = vector.broadcast %c0_i32_18 : i32 to vector<8x256xi32>
      %40 = arith.cmpi ne, %38, %39 : vector<8x256xi32>
      %c0_i32_19 = arith.constant 0 : i32
      %41 = vector.broadcast %c0_i32_19 : i32 to vector<8x256xi32>
      %42 = arith.cmpi slt, %38, %41 : vector<8x256xi32>
      %c0_i32_20 = arith.constant 0 : i32
      %43 = arith.cmpi slt, %36, %c0_i32_20 : i32
      %44 = vector.broadcast %43 : i1 to vector<8x256xi1>
      %45 = vector.broadcast %44 : vector<8x256xi1> to vector<8x256xi1>
      %46 = arith.xori %42, %45 : vector<8x256xi1>
      %47 = arith.andi %46, %40 : vector<8x256xi1>
      %48 = vector.broadcast %36 : i32 to vector<8x256xi32>
      %49 = arith.addi %38, %48 : vector<8x256xi32>
      %50 = arith.select %47, %49, %38 : vector<8x256xi1>, vector<8x256xi32>
      %c0_i32_21 = arith.constant 0 : i32
      %51 = vector.broadcast %c0_i32_21 : i32 to vector<8x256xi32>
      %52 = arith.cmpi eq, %50, %51 : vector<8x256xi32>
      %c15_i32 = arith.constant 15 : i32
      %53 = vector.broadcast %c15_i32 : i32 to vector<8x256xi32>
      %54 = arith.cmpi eq, %50, %53 : vector<8x256xi32>
      %c16_i32_22 = arith.constant 16 : i32
      %55 = vector.broadcast %c16_i32_22 : i32 to vector<8x256xi32>
      %56 = arith.cmpi slt, %34, %55 : vector<8x256xi32>
      %c240_i32 = arith.constant 240 : i32
      %57 = vector.broadcast %c240_i32 : i32 to vector<8x256xi32>
      %58 = arith.cmpi sge, %34, %57 : vector<8x256xi32>
      %c1_i32_23 = arith.constant 1 : i32
      %59 = tpu.dynamic_rotate %33 by %c1_i32_23 dim 1 : vector<8x256xf32>, i32 -> vector<8x256xf32>
      %c255_i32 = arith.constant 255 : i32
      %60 = tpu.dynamic_rotate %33 by %c255_i32 dim 1 : vector<8x256xf32>, i32 -> vector<8x256xf32>
      %61 = arith.select %52, %60, %59 : vector<8x256xi1>, vector<8x256xf32>
      %62 = arith.select %54, %59, %60 : vector<8x256xi1>, vector<8x256xf32>
      %63 = arith.addf %61, %62 : vector<8x256xf32>
      %64 = vector.broadcast %31 : f32 to vector<8x256xf32>
      %65 = arith.mulf %64, %63 : vector<8x256xf32>
      %66 = vector.broadcast %32 : f32 to vector<8x256xf32>
      %67 = arith.mulf %66, %33 : vector<8x256xf32>
      %68 = arith.addf %65, %67 : vector<8x256xf32>
      %c16_i32_24 = arith.constant 16 : i32
      %69 = tpu.dynamic_rotate %68 by %c16_i32_24 dim 1 : vector<8x256xf32>, i32 -> vector<8x256xf32>
      %c240_i32_25 = arith.constant 240 : i32
      %70 = tpu.dynamic_rotate %68 by %c240_i32_25 dim 1 : vector<8x256xf32>, i32 -> vector<8x256xf32>
      %71 = arith.select %56, %70, %69 : vector<8x256xi1>, vector<8x256xf32>
      %72 = arith.select %58, %69, %70 : vector<8x256xi1>, vector<8x256xf32>
      %73 = arith.addf %71, %72 : vector<8x256xf32>
      %74 = vector.broadcast %31 : f32 to vector<8x256xf32>
      %75 = arith.mulf %74, %73 : vector<8x256xf32>
      %76 = vector.broadcast %32 : f32 to vector<8x256xf32>
      %77 = arith.mulf %76, %68 : vector<8x256xf32>
      %78 = arith.addf %75, %77 : vector<8x256xf32>
      %c0_26 = arith.constant 0 : index
      %c0_27 = arith.constant 0 : index
      %79 = vector.load %arg5[%c0_26, %c0_27] : memref<8x256xf32, #tpu.memory_space<vmem>>, vector<8x256xf32>
      tpu.vector_store %arg5[%c0_26, %c0_27], %78 {strides = array<i32>} : memref<8x256xf32, #tpu.memory_space<vmem>>, vector<8x256xf32>,
    } else {
    }
    %c0_1 = arith.constant 0 : index
    %4 = memref.load %arg2[%c0_1] : memref<2xi32, #tpu.memory_space<smem>>
    %c0_i32_2 = arith.constant 0 : i32
    %5 = arith.cmpi eq, %4, %c0_i32_2 : i32
    %6 = arith.extui %5 : i1 to i32
    %c0_i32_3 = arith.constant 0 : i32
    %7 = arith.cmpi ne, %6, %c0_i32_3 : i32
    scf.if %7 {
      %c0_13 = arith.constant 0 : index
      %c0_14 = arith.constant 0 : index
      %31 = vector.load %arg3[%c0_13, %c0_14] : memref<8x256xf32, #tpu.memory_space<vmem>>, vector<8x256xf32>
      %c0_15 = arith.constant 0 : index
      %c0_16 = arith.constant 0 : index
      %32 = vector.load %arg5[%c0_15, %c0_16] : memref<8x256xf32, #tpu.memory_space<vmem>>, vector<8x256xf32>
      tpu.vector_store %arg5[%c0_15, %c0_16], %31 {strides = array<i32>} : memref<8x256xf32, #tpu.memory_space<vmem>>, vector<8x256xf32>,
    } else {
    }
    %c1 = arith.constant 1 : index
    %8 = memref.load %arg2[%c1] : memref<2xi32, #tpu.memory_space<smem>>
    %c0_i32_4 = arith.constant 0 : i32
    %9 = arith.cmpi ne, %8, %c0_i32_4 : i32
    %10 = arith.extui %9 : i1 to i32
    %c0_i32_5 = arith.constant 0 : i32
    %11 = arith.cmpi ne, %10, %c0_i32_5 : i32
    scf.if %11 {
      %c2 = arith.constant 2 : index
      %31 = memref.load %arg1[%c2] : memref<6xf32, #tpu.memory_space<smem>>
      %c0_13 = arith.constant 0 : index
      %c0_14 = arith.constant 0 : index
      %32 = vector.load %arg5[%c0_13, %c0_14] : memref<8x256xf32, #tpu.memory_space<vmem>>, vector<8x256xf32>
      %c0_15 = arith.constant 0 : index
      %c0_16 = arith.constant 0 : index
      %33 = vector.load %arg4[%c0_15, %c0_16] : memref<8x256xf32, #tpu.memory_space<vmem>>, vector<8x256xf32>
      %34 = vector.broadcast %31 : f32 to vector<8x256xf32>
      %35 = arith.mulf %34, %33 : vector<8x256xf32>
      %36 = arith.addf %32, %35 : vector<8x256xf32>
      %cst_17 = arith.constant 0.000000e+00 : f32
      %cst_18 = arith.constant 1.000000e+00 : f32
      %37 = vector.broadcast %cst_17 : f32 to vector<8x256xf32>
      %38 = arith.maximumf %37, %36 : vector<8x256xf32>
      %39 = vector.broadcast %cst_18 : f32 to vector<8x256xf32>
      %40 = arith.minimumf %39, %38 : vector<8x256xf32>
      %c0_19 = arith.constant 0 : index
      %c0_20 = arith.constant 0 : index
      %41 = vector.load %arg5[%c0_19, %c0_20] : memref<8x256xf32, #tpu.memory_space<vmem>>, vector<8x256xf32>
      tpu.vector_store %arg5[%c0_19, %c0_20], %40 {strides = array<i32>} : memref<8x256xf32, #tpu.memory_space<vmem>>, vector<8x256xf32>,
    } else {
    }
    %c3 = arith.constant 3 : index
    %12 = memref.load %arg1[%c3] : memref<6xf32, #tpu.memory_space<smem>>
    %c4 = arith.constant 4 : index
    %13 = memref.load %arg1[%c4] : memref<6xf32, #tpu.memory_space<smem>>
    %c5 = arith.constant 5 : index
    %14 = memref.load %arg1[%c5] : memref<6xf32, #tpu.memory_space<smem>>
    %c0_6 = arith.constant 0 : index
    %c0_7 = arith.constant 0 : index
    %15 = vector.load %arg5[%c0_6, %c0_7] : memref<8x256xf32, #tpu.memory_space<vmem>>, vector<8x256xf32>
    %16 = vector.broadcast %12 : f32 to vector<8x256xf32>
    %17 = arith.addf %15, %16 : vector<8x256xf32>
    %cst = arith.constant 0.000000e+00 : f32
    %cst_8 = arith.constant 1.000000e+00 : f32
    %18 = vector.broadcast %cst : f32 to vector<8x256xf32>
    %19 = arith.maximumf %18, %17 : vector<8x256xf32>
    %20 = vector.broadcast %cst_8 : f32 to vector<8x256xf32>
    %21 = arith.minimumf %20, %19 : vector<8x256xf32>
    %22 = vector.broadcast %13 : f32 to vector<8x256xf32>
    %23 = arith.mulf %22, %21 : vector<8x256xf32>
    %24 = vector.broadcast %14 : f32 to vector<8x256xf32>
    %25 = arith.addf %23, %24 : vector<8x256xf32>
    %cst_9 = arith.constant 0.000000e+00 : f32
    %cst_10 = arith.constant 1.000000e+00 : f32
    %26 = vector.broadcast %cst_9 : f32 to vector<8x256xf32>
    %27 = arith.maximumf %26, %25 : vector<8x256xf32>
    %28 = vector.broadcast %cst_10 : f32 to vector<8x256xf32>
    %29 = arith.minimumf %28, %27 : vector<8x256xf32>
    %c0_11 = arith.constant 0 : index
    %c0_12 = arith.constant 0 : index
    %30 = vector.load %arg5[%c0_11, %c0_12] : memref<8x256xf32, #tpu.memory_space<vmem>>, vector<8x256xf32>
    tpu.vector_store %arg5[%c0_11, %c0_12], %29 {strides = array<i32>} : memref<8x256xf32, #tpu.memory_space<vmem>>, vector<8x256xf32>,
    return
  }
  func.func @transform_0(%arg0: i32) -> i32 {
    %c0_i32 = arith.constant 0 : i32
    %c0_i32_0 = arith.constant 0 : i32
    return %c0_i32 : i32
  }
  func.func @transform_1(%arg0: i32) -> i32 {
    %c0_i32 = arith.constant 0 : i32
    %c0_i32_0 = arith.constant 0 : i32
    return %c0_i32 : i32
  }
  func.func @transform_2(%arg0: i32) -> (i32, i32) {
    %c0_i32 = arith.constant 0 : i32
    %c0_i32_0 = arith.constant 0 : i32
    return %arg0, %c0_i32 : i32, i32
  }
  func.func @transform_3(%arg0: i32) -> (i32, i32) {
    %c0_i32 = arith.constant 0 : i32
    %c0_i32_0 = arith.constant 0 : i32
    return %arg0, %c0_i32 : i32, i32
  }
  func.func @transform_4(%arg0: i32) -> (i32, i32) {
    %c0_i32 = arith.constant 0 : i32
    %c0_i32_0 = arith.constant 0 : i32
    return %arg0, %c0_i32 : i32, i32
  }
}

</mosaic_0001>

<bundles_post_ra>
// kernel: tpu_custom_call.1
= control target key start
LH: loop header
LB: loop body
LE: loop exit
PB: predicated region body
PF: predicated region fallthrough
CT: control target
= control target key end

     0   :  { %9 = vsyncpa [#allocation5], 0  ;;  %s449_s0 = inlined_call_operand.hbm [shape: f32[6], index: 0, kind: input, shape index: {}]   ;;  %s450_s1 = inlined_call_operand.vmem [shape: s32[2], index: 1, kind: input, shape index: {}]   ;;  %s451_s2 = inlined_call_operand.hbm [shape: f32[8,256], index: 2, kind: input, shape index: {}]   ;;  %s452_s3 = inlined_call_operand.hbm [shape: f32[8,256], index: 3, kind: input, shape index: {}]   ;;  %s453_s4 = inlined_call_operand.hbm [shape: f32[8,256], index: 4, kind: output, shape index: {}]  }
   0x1   :  { %10 = vsyncpa [#allocation6], 0 }
   0x2   :  { %11 = vsyncpa [#allocation3], 0 }
   0x3   :  { %12 = vsyncpa [#allocation10], 0 }
   0x4   :  { %13 = vsyncpa [#allocation4], 0  ;;  %s28_s17 = sshll.u32 %s450_s1, 4  ;;  %s254_s20 = scalar_lea.hbm %s449_s0, 16  ;;  %s29_s17 = int_to_ptr.vmem [resolvable:$true] %s28_s17 }
   0x5   :  { %p255_p0 = scmp.ne.s32.totalorder %s449_s0, %s254_s20  ;;  %p258_p1 = scmp.lt.u32.totalorder %s254_s20, %s449_s0 }
   0x7   :  { %p260_p2 = pnand %p258_p1, %p255_p0 }
   0x9   :  { %263 = shalt.err (!%p260_p2)
}
   0xa   :  { %s352_s25 = smov [#allocation2]   ;;  %s264_s1 = scalar_lea.vmem %s29_s17, 16 }
   0xb   :  { %21 = dma.hbm_to_smem %s449_s0, 16, %s352_s25, [#allocation5]  }
   0xc   :  { %p265_p3 = scmp.ne.s32.totalorder %s29_s17, %s264_s1  ;;  %p269_p4 = scmp.lt.s32.totalorder %s29_s17, %s29_s17 }
   0xd   :  { %p270_p5 = scmp.lt.s32.totalorder %s264_s1, %s264_s1 }
   0xf   :  { %p271_p6 = por %p270_p5, %p269_p4 }
  0x11   :  { %p272_p7 = pnand %p271_p6, %p265_p3 }
  0x13   :  { %275 = shalt.err (!%p272_p7)
}
  0x14   :  { %s353_s28 = smov [#allocation7]   ;;  %s354_s29 = smov [#allocation8]  }
  0x15   :  { %31 = dma.vmem_to_smem %s29_s17, 16, %s353_s28, [#allocation6]  }
  0x16   :  { %s38_s30 = sshll.u32 %s354_s29, 4  ;;  %s355_s5 = smov [#allocation9]   ;;  %s39_s30 = int_to_ptr.vmem [resolvable:$true] %s38_s30 }
  0x17   :  { %s48_s6 = sshll.u32 %s355_s5, 4  ;;  %s276_s0 = scalar_lea.hbm %s451_s2, 256  ;;  %s49_s6 = int_to_ptr.vmem [resolvable:$true] %s48_s6 }
  0x18   :  { %p277_p8 = scmp.ne.s32.totalorder %s451_s2, %s276_s0  ;;  %p280_p9 = scmp.lt.u32.totalorder %s276_s0, %s451_s2 }
  0x1a   :  { %p282_p10 = pnand %p280_p9, %p277_p8 }
  0x1c   :  { %285 = shalt.err (!%p282_p10)
}
  0x1d   :  { %s286_s13 = scalar_lea.vmem %s39_s30, 256  ;;  %p291_p12 = scmp.lt.s32.totalorder %s39_s30, %s39_s30 }
  0x1e   :  { %p287_p11 = scmp.ne.s32.totalorder %s39_s30, %s286_s13  ;;  %p292_p13 = scmp.lt.s32.totalorder %s286_s13, %s286_s13 }
  0x20   :  { %p293_p0 = por %p292_p13, %p291_p12 }
  0x22   :  { %p294_p1 = pnand %p293_p0, %p287_p11 }
  0x24   :  { %297 = shalt.err (!%p294_p1)
}
  0x25   :  { %41 = dma.hbm_to_vmem [thread:$0]  %s451_s2, 256, %s39_s30, [#allocation3]  }
  0x26   :  { %s298_s18 = scalar_lea.hbm %s452_s3, 256 }
  0x27   :  { %p299_p2 = scmp.ne.s32.totalorder %s452_s3, %s298_s18  ;;  %p302_p3 = scmp.lt.u32.totalorder %s298_s18, %s452_s3 }
  0x29   :  { %p304_p4 = pnand %p302_p3, %p299_p2 }
  0x2b   :  { %307 = shalt.err (!%p304_p4)
}
  0x2c   :  { %s308_s23 = scalar_lea.vmem %s49_s6, 256  ;;  %p313_p6 = scmp.lt.s32.totalorder %s49_s6, %s49_s6 }
  0x2d   :  { %p309_p5 = scmp.ne.s32.totalorder %s49_s6, %s308_s23  ;;  %p314_p7 = scmp.lt.s32.totalorder %s308_s23, %s308_s23 }
  0x2f   :  { %p315_p8 = por %p314_p7, %p313_p6 }
  0x31   :  { %p316_p9 = pnand %p315_p8, %p309_p5 }
  0x33   :  { %319 = shalt.err (!%p316_p9)
}
  0x34   :  { %51 = dma.hbm_to_vmem [thread:$0]  %s452_s3, 256, %s49_s6, [#allocation10]  }
  0x35   :  { %342 = dma.done.wait [#allocation5], 16  }
  0x36   :  { %343 = vsyncadd [#allocation5], 4294967280 }
  0x37   :  { %344 = dma.done.wait [#allocation6], 16  }
  0x38   :  { %345 = vsyncadd [#allocation6], 4294967280 }
  0x39   :  { %346 = dma.done.wait [#allocation3], 256  }
  0x3a   :  { %347 = vsyncadd [#allocation3], 4294967040 }
  0x3b   :  { %348 = dma.done.wait [#allocation10], 256  }
  0x3c   :  { %349 = vsyncadd [#allocation10], 4294967040 }
  0x3d   :  { %64 = sfence }
  0x3e   :  { %s65_s25 = sld [smem:[#allocation7]] }
  0x44   :  { %p236_p10 = scmp.eq.s32.totalorder %s65_s25, 0 }
  0x45   :  { %v72_v0 = vld [vmem:[#allocation8] sm:$0xff] (!%p236_p10)  ;;  %s356_s26 = smov (!%p236_p10), 127   ;;  %s357_s27 = smov (!%p236_p10), 1   ;;  %v73_v1 = vld [vmem:[#allocation8 + $0x8] sm:$0xff] (!%p236_p10)  ;;  %v74_v2 = vlaneseq (!%p236_p10) }
  0x46   :  { %69 = sbr.rel (%p236_p10) target bundleno = 325 (0x145), region = 37  ;;  %116 = vrot.lane.b32.xlu1 (!%p236_p10), %v72_v0, %s356_s26  ;;  %109 = vrot.lane.b32.xlu0 (!%p236_p10), %v72_v0, %s357_s27  ;;  %s237_s3 = sld [smem:[#allocation2 + $0x1]] (!%p236_p10) }
  0x47   :  { %v75_v3 = vand.u32 (!%p236_p10), 127, %v74_v2  ;;  %s70_s1 = sld [smem:[#allocation2]] (!%p236_p10)  ;;  %s358_s28 = smov (!%p236_p10), 16  }
  0x48   :  { %s359_s29 = smov (!%p236_p10), 112  }
  0x49   :  { %v76_v4 = vadd.s32 (!%p236_p10), 128, %v75_v3  ;;  %v81_v6 = vand.u32 (!%p236_p10), 15, %v75_v3  ;;  %vm120_vm0 = vcmp.lt.s32.totalorder (!%p236_p10), %v75_v3, 127  ;;  %vm113_vm1 = vcmp.lt.s32.totalorder (!%p236_p10), %v75_v3, 1 }
  0x4a   :  { %118 = vrot.lane.b32.xlu1 (!%p236_p10), %v73_v1, %s356_s26  ;;  %111 = vrot.lane.b32.xlu0 (!%p236_p10), %v73_v1, %s357_s27  ;;  %vm105_vm6 = vcmp.lt.s32.totalorder (!%p236_p10), %v75_v3, 16  ;;  %vm147_vm7 = vcmp.lt.s32.totalorder (!%p236_p10), %v75_v3, 112 }
  0x4b   :  { %v88_v7 = vand.u32 (!%p236_p10), 15, %v76_v4  ;;  %vm425_vm2 = vcmp.eq.s32.totalorder (!%p236_p10), %v81_v6, 0  ;;  %vm103_vm4 = vcmp.eq.s32.totalorder (!%p236_p10), %v81_v6, 15  ;;  %vm108_vm8 = vcmp.ge.s32.totalorder (!%p236_p10), %v76_v4, 240 }
  0x4c   :  { %v132_v12 = vstv (!%p236_p10), %s237_s3 }
  0x4d   :  { %vm429_vm3 = vcmp.eq.s32.totalorder %v88_v7, 0  ;;  %vm104_vm5 = vcmp.eq.s32.totalorder %v88_v7, 15  ;;  %v129_v18 = vstv %s70_s1  ;;  %v133_v23 = vmul.f32 %v132_v12, %v72_v0 }
  0x4e   :  { %v134_v24 = vmul.f32 %v132_v12, %v73_v1 }
  0xb8   :  { %v117_v5 = vpop.permute.xlu1 %116  ;;  %v110_v8 = vpop.permute.xlu0 %109 }
  0xbc   :  { %v119_v9 = vpop.permute.xlu1 %118  ;;  %v112_v15 = vpop.permute.xlu0 %111 }
  0xbd   :  { %v121_v13 = vsel %vm120_vm0, %v117_v5, %v119_v9  ;;  %v122_v14 = vsel %vm120_vm0, %v119_v9, %v117_v5  ;;  %v114_v16 = vsel %vm113_vm1, %v110_v8, %v112_v15  ;;  %v115_v17 = vsel %vm113_vm1, %v112_v15, %v110_v8 }
  0xbe   :  { %v123_v19 = vsel %vm425_vm2, %v121_v13, %v115_v17  ;;  %v124_v20 = vsel %vm429_vm3, %v122_v14, %v114_v16  ;;  %v125_v21 = vsel %vm103_vm4, %v115_v17, %v121_v13  ;;  %v126_v22 = vsel %vm104_vm5, %v114_v16, %v122_v14 }
  0xbf   :  { %v127_v25 = vadd.f32 %v125_v21, %v123_v19  ;;  %v128_v26 = vadd.f32 %v126_v22, %v124_v20 }
  0xc1   :  { %v131_v27 = vmul.f32 %v129_v18, %v128_v26  ;;  %v130_v28 = vmul.f32 %v129_v18, %v127_v25 }
  0xc3   :  { %v136_v29 = vadd.f32 %v134_v24, %v131_v27  ;;  %v135_v30 = vadd.f32 %v133_v23, %v130_v28 }
  0xc5   :  { %139 = vrot.lane.b32.xlu1 %v136_v29, %s358_s28  ;;  %137 = vrot.lane.b32.xlu0 %v135_v30, %s358_s28  ;;  %v159_v43 = vmul.f32 %v136_v29, %v132_v12  ;;  %v158_v44 = vmul.f32 %v135_v30, %v132_v12 }
  0xc9   :  { %145 = vrot.lane.b32.xlu1 %v136_v29, %s359_s29  ;;  %143 = vrot.lane.b32.xlu0 %v135_v30, %s359_s29 }
 0x137   :  { %v140_v31 = vpop.permute.xlu1 %139  ;;  %v138_v32 = vpop.permute.xlu0 %137 }
 0x138   :  { %v141_v35 = vsel %vm105_vm6, %v138_v32, %v140_v31  ;;  %v142_v36 = vsel %vm105_vm6, %v140_v31, %v138_v32 }
 0x13b   :  { %v146_v33 = vpop.permute.xlu1 %145  ;;  %v144_v34 = vpop.permute.xlu0 %143 }
 0x13c   :  { %v148_v37 = vsel %vm147_vm7, %v144_v34, %v146_v33  ;;  %v149_v38 = vsel %vm147_vm7, %v146_v33, %v144_v34 }
 0x13d   :  { %v150_v39 = vsel %vm105_vm6, %v148_v37, %v142_v36  ;;  %v153_v40 = vsel %vm108_vm8, %v141_v35, %v149_v38 }
 0x13e   :  { %v154_v41 = vadd.f32 %v150_v39, %v148_v37  ;;  %v155_v42 = vadd.f32 %v153_v40, %v141_v35 }
 0x140   :  { %v156_v45 = vmul.f32 %v154_v41, %v129_v18  ;;  %v157_v46 = vmul.f32 %v155_v42, %v129_v18 }
 0x142   :  { %v160_v47 = vadd.f32 %v158_v44, %v156_v45  ;;  %v161_v48 = vadd.f32 %v159_v43, %v157_v46 }
 0x144   :  { %162 = vst [vmem:[#allocation11] sm:$0xff] %v160_v47  ;;  %163 = vst [vmem:[#allocation11 + $0x8] sm:$0xff] %v161_v48 }
 0x145 PF:  { %s164_s30 = sld [smem:[#allocation7]] }
 0x14b   :  { %p238_p11 = scmp.ne.s32.totalorder %s164_s30, 0 }
 0x14c   :  { %v169_v49 = vld [vmem:[#allocation8] sm:$0xff] (!%p238_p11)  ;;  %v170_v50 = vld [vmem:[#allocation8 + $0x8] sm:$0xff] (!%p238_p11) }
 0x14d   :  { %168 = sbr.rel (%p238_p11) target bundleno = 340 (0x154), region = 41  ;;  %171 = vst [vmem:[#allocation11] sm:$0xff] (!%p238_p11), %v169_v49  ;;  %172 = vst [vmem:[#allocation11 + $0x8] sm:$0xff] (!%p238_p11), %v170_v50 }
 0x154 PF:  { %s239_s5 = sld [smem:[#allocation7 + $0x1]] }
 0x15a   :  { %p240_p12 = scmp.eq.s32.totalorder %s239_s5, 0 }
 0x15b   :  { %s241_s6 = sld [smem:[#allocation2 + $0x2]] (!%p240_p12)  ;;  %v181_v51 = vld [vmem:[#allocation9] sm:$0xff] (!%p240_p12)  ;;  %v182_v52 = vld [vmem:[#allocation9 + $0x8] sm:$0xff] (!%p240_p12)  ;;  %v179_v53 = vld [vmem:[#allocation11] sm:$0xff] (!%p240_p12) }
 0x15c   :  { %177 = sbr.rel (%p240_p12) target bundleno = 363 (0x16b), region = 45  ;;  %v180_v55 = vld [vmem:[#allocation11 + $0x8] sm:$0xff] (!%p240_p12) }
 0x161   :  { %v183_v54 = vstv (!%p240_p12), %s241_s6 }
 0x162   :  { %v184_v56 = vmul.f32 (!%p240_p12), %v183_v54, %v181_v51  ;;  %v185_v57 = vmul.f32 (!%p240_p12), %v183_v54, %v182_v52 }
 0x164   :  { %v186_v58 = vadd.f32 %v184_v56, %v179_v53  ;;  %v187_v59 = vadd.f32 %v185_v57, %v180_v55 }
 0x166   :  { %v188_v60 = vmax.f32 %v186_v58, 0.0  ;;  %v189_v61 = vmax.f32 %v187_v59, 0.0 }
 0x168   :  { %v190_v62 = vmin.f32 %v188_v60, 1.0  ;;  %v191_v63 = vmin.f32 %v189_v61, 1.0 }
 0x16a   :  { %192 = vst [vmem:[#allocation11] sm:$0xff] %v190_v62  ;;  %193 = vst [vmem:[#allocation11 + $0x8] sm:$0xff] %v191_v63 }
 0x16b PF:  { %s242_s7 = sld [smem:[#allocation2 + $0x3]]  ;;  %s243_s8 = sld [smem:[#allocation2 + $0x4]] }
 0x16c   :  { %s244_s0 = sld [smem:[#allocation2 + $0x5]]  ;;  %s360_s9 = smov [#allocation11]  }
 0x16d   :  { %s224_s10 = sshll.u32 %s360_s9, 4  ;;  %s225_s10 = int_to_ptr.vmem [resolvable:$true] %s224_s10 }
 0x16e   :  { %s320_s11 = scalar_lea.vmem %s225_s10, 256  ;;  %p325_p0 = scmp.lt.s32.totalorder %s225_s10, %s225_s10 }
 0x16f   :  { %p321_p13 = scmp.ne.s32.totalorder %s225_s10, %s320_s11  ;;  %p326_p1 = scmp.lt.s32.totalorder %s320_s11, %s320_s11 }
 0x171   :  { %v197_v0 = vld [vmem:[#allocation11] sm:$0xff]  ;;  %v198_v1 = vld [vmem:[#allocation11 + $0x8] sm:$0xff]  ;;  %v199_v2 = vstv %s242_s7  ;;  %v206_v7 = vstv %s243_s8  ;;  %p327_p2 = por %p326_p1, %p325_p0 }
 0x172   :  { %v200_v3 = vadd.f32 %v199_v2, %v197_v0  ;;  %v201_v4 = vadd.f32 %v199_v2, %v198_v1  ;;  %v209_v10 = vstv %s244_s0 }
 0x173   :  { %p328_p3 = pnand %p327_p2, %p321_p13 }
 0x174   :  { %v202_v5 = vmax.f32 %v200_v3, 0.0  ;;  %v203_v6 = vmax.f32 %v201_v4, 0.0 }
 0x176   :  { %v204_v8 = vmin.f32 %v202_v5, 1.0  ;;  %v205_v9 = vmin.f32 %v203_v6, 1.0 }
 0x178   :  { %v207_v11 = vmul.f32 %v206_v7, %v204_v8  ;;  %v208_v12 = vmul.f32 %v206_v7, %v205_v9 }
 0x17a   :  { %v210_v13 = vadd.f32 %v209_v10, %v207_v11  ;;  %v211_v14 = vadd.f32 %v209_v10, %v208_v12 }
 0x17c   :  { %v212_v15 = vmax.f32 %v210_v13, 0.0  ;;  %v213_v16 = vmax.f32 %v211_v14, 0.0 }
 0x17e   :  { %v214_v17 = vmin.f32 %v212_v15, 1.0  ;;  %v215_v18 = vmin.f32 %v213_v16, 1.0 }
 0x180   :  { %216 = vst [vmem:[#allocation11] sm:$0xff] %v214_v17  ;;  %217 = vst [vmem:[#allocation11 + $0x8] sm:$0xff] %v215_v18 }
 0x181   :  { %331 = shalt.err (!%p328_p3)
}
 0x182   :  { %s332_s14 = scalar_lea.hbm %s453_s4, 256 }
 0x183   :  { %p333_p4 = scmp.ne.s32.totalorder %s453_s4, %s332_s14  ;;  %p336_p5 = scmp.lt.u32.totalorder %s332_s14, %s453_s4 }
 0x185   :  { %p338_p6 = pnand %p336_p5, %p333_p4 }
 0x187   :  { %341 = shalt.err (!%p338_p6)
}
 0x188   :  { %227 = dma.vmem_to_hbm [thread:$0]  %s225_s10, 256, %s453_s4, [#allocation4]  }
 0x189   :  { %350 = dma.done.wait [#allocation4], 256  }
 0x18a   :  { %351 = vsyncadd [#allocation4], 4294967040 }
 0x18b   :  { %231 = vsyncpa [#allocation3], 1 }
 0x18c   :  { %232 = vsyncpa [#allocation10], 1 }
 0x18d   :  { %233 = vsyncpa [#allocation4], 1 }
 0x18e   :  { %234 = vsyncpa [#allocation5], 1 }
 0x18f   :  { %235 = vsyncpa [#allocation6], 1 }

</bundles_post_ra>
